<compile_context>
chip_gen: v7x
topology: tpu7x:2x2x1
jax: 0.10.0
libtpu: 0.0.40
codegen_flags: <defaults>
</compile_context>

<pallas_src>
import math

import jax
import jax.numpy as jnp
from jax import lax
from jax.experimental import pallas as pl
from jax.experimental.pallas import tpu as pltpu


def _round_up(v, m):
    return ((v + m - 1) // m) * m


def _make_alif_kernel(T_total, t_chunk, decay_mem, decay_thr, thresh_rest,
                      static_chunks):
    """ALIF kernel for one (t_chunk, S, 128) time-major block.

    Grid = (n_blocks_over_N, n_chunks_over_T); the T axis is innermost and
    'arbitrary', with (mem, thr) carried in the resident state-output blocks.
    """
    thresh_rest = float(thresh_rest)

    def kernel(x_ref, spk_ref, mem_ref, thr_ref):
        j = pl.program_id(1)                      # T-chunk index (innermost)

        @pl.when(j == 0)
        def _init():
            mem_ref[...] = jnp.zeros_like(mem_ref)
            thr_ref[...] = jnp.full(thr_ref.shape, thresh_rest, jnp.float32)

        mem = mem_ref[...]                        # (S, 128) f32 carry
        thr = thr_ref[...]

        def step(t, carry):
            mem, thr = carry
            xt = x_ref[t].astype(jnp.float32)     # dense (S, 128) slab load
            mem = mem * decay_mem + xt
            # snntorch surrogate.ATan forward: Heaviside, strict '>' at 0.
            spike = (mem > thr).astype(jnp.float32)
            mem = mem - thr * spike               # reset_mechanism='subtract'
            thr = thr * decay_thr + spike * thresh_rest
            spk_ref[t] = spike.astype(spk_ref.dtype)   # dense (S, 128) store
            return mem, thr

        if static_chunks:
            # Every chunk is full: static trip count, modest unroll.
            unroll = t_chunk if t_chunk <= 32 else 8
            mem, thr = lax.fori_loop(0, t_chunk, step, (mem, thr),
                                     unroll=unroll)
        else:
            # Last chunk may be partial: only scan the real time steps so the
            # final (mem, thr) state stays exact.
            t_hi = jnp.minimum(t_chunk, T_total - j * t_chunk)
            mem, thr = lax.fori_loop(0, t_hi, step, (mem, thr))

        mem_ref[...] = mem
        thr_ref[...] = thr

    return kernel


def adaptive_lif_forward(x, tau_mem=20.0, tau_thresh=60.0, thresh_rest=1.0,
                         block_neurons=2048,
                         vmem_block_budget=12 * 1024 * 1024,
                         return_state=False):
    """x: (B, C, P, T) or (B, C, P) float array (matching the nn.Module).

    Returns spikes with the same shape/dtype as x; with return_state=True also
    returns the final (mem, threshold) state, each shaped (B, C, P) in f32
    (mirrors the module's persistent buffers).
    """
    orig_ndim = x.ndim
    if orig_ndim == 3:
        x = x[..., None]                  # single time step, like unsqueeze(-1)
    B, C, P, T = x.shape
    N = B * C * P
    out_dtype = x.dtype
    in_itemsize = jnp.dtype(x.dtype).itemsize
    out_itemsize = jnp.dtype(out_dtype).itemsize

    # ---- time-major relayout (wrapper-side XLA transpose) -------------------
    # Each time step of the recurrence must see a dense (sublane x lane) slab
    # of neurons, so the kernel consumes x as (T, N/128, 128).  Input dtype is
    # preserved (no f32 up-cast pass over HBM).
    x2 = x.reshape(N, T)
    Np = _round_up(N, 128)
    if Np != N:
        # Only when N is not lane-aligned; padded rows are sliced away below.
        x2 = jnp.pad(x2, ((0, Np - N), (0, 0)))
    G = Np // 128                               # number of 128-neuron lane groups
    x3 = jnp.transpose(x2, (1, 0)).reshape(T, G, 128)

    # ---- block sizing --------------------------------------------------------
    s_blk = max(8, (block_neurons // 128 // 8) * 8)   # lane groups per block
    if G <= s_blk:
        S = G                                    # full dim -> any S is legal
        if G >= 16:
            # Keep >= 2 grid steps over N (v7x megacore) without dropping
            # below full (8,128) vreg density.
            S = _round_up(-(-G // 2), 8)
    else:
        S = s_blk                                # multiple of 8, < G
    n_blocks = -(-G // S)                        # ragged last block is masked

    # Time chunking: keep double-buffered in/out blocks inside the VMEM budget
    # (important on v7x: 64 MiB physical / 32 MiB scoped default).
    bytes_per_row = S * 128 * 2 * (in_itemsize + out_itemsize)
    t_chunk = max(1, min(T, vmem_block_budget // max(1, bytes_per_row)))
    if t_chunk < T:
        t_chunk = max(8, (t_chunk // 8) * 8)
    n_tchunks = -(-T // t_chunk)
    static_chunks = (T % t_chunk) == 0

    decay_mem = math.exp(-1.0 / float(tau_mem))
    decay_thr = math.exp(-1.0 / float(tau_thresh))

    kernel = _make_alif_kernel(T, t_chunk, decay_mem, decay_thr,
                               float(thresh_rest), static_chunks)

    spk3, mem2, thr2 = pl.pallas_call(
        kernel,
        out_shape=(
            jax.ShapeDtypeStruct((T, G, 128), out_dtype),   # spikes (time-major)
            jax.ShapeDtypeStruct((G, 128), jnp.float32),    # final membrane
            jax.ShapeDtypeStruct((G, 128), jnp.float32),    # final threshold
        ),
        grid=(n_blocks, n_tchunks),
        in_specs=[pl.BlockSpec((t_chunk, S, 128), lambda i, j: (j, i, 0))],
        out_specs=(
            pl.BlockSpec((t_chunk, S, 128), lambda i, j: (j, i, 0)),
            pl.BlockSpec((S, 128), lambda i, j: (i, 0)),   # resident over T chunks
            pl.BlockSpec((S, 128), lambda i, j: (i, 0)),   # (carries the state)
        ),
        compiler_params=pltpu.CompilerParams(
            dimension_semantics=("parallel", "arbitrary"),
            vmem_limit_bytes=48 * 1024 * 1024,
        ),
    )(x3)

    # Back to the module's native (B, C, P, T) layout; padded / ragged neurons
    # (N..Np and block overhang) are sliced away here.
    spikes = jnp.transpose(spk3.reshape(T, Np), (1, 0))[:N].reshape(B, C, P, T)
    if orig_ndim == 3:
        spikes = spikes[..., 0]
    if return_state:
        mem = mem2.reshape(Np)[:N].reshape(B, C, P)
        thr = thr2.reshape(Np)[:N].reshape(B, C, P)
        return spikes, (mem, thr)
    return spikes


def _reference_forward(x, tau_mem=20.0, tau_thresh=60.0, thresh_rest=1.0):
    """Pure-JAX reference mirroring the PyTorch loop (returns final state too)."""
    orig_ndim = x.ndim
    if orig_ndim == 3:
        x = x[..., None]
    B, C, P, T = x.shape
    mem = jnp.zeros((B, C, P), jnp.float32)
    thr = jnp.full((B, C, P), thresh_rest, jnp.float32)
    dm = math.exp(-1.0 / tau_mem)
    dt = math.exp(-1.0 / tau_thresh)
    outs = []
    for t in range(T):
        mem = mem * dm + x[..., t].astype(jnp.float32)
        spike = (mem > thr).astype(jnp.float32)     # ATan surrogate fwd: strict >
        mem = mem - thr * spike
        thr = thr * dt + spike * thresh_rest
        outs.append(spike)
    spikes = jnp.stack(outs, axis=-1).astype(x.dtype)
    if orig_ndim == 3:
        spikes = spikes[..., 0]
    return spikes, mem, thr


def _check(x, **kwargs):
    spikes, (mem, thr) = adaptive_lif_forward(x, return_state=True, **kwargs)
    spikes = jax.block_until_ready(spikes)
    r_spk, r_mem, r_thr = _reference_forward(x)
    assert spikes.shape == x.shape, "shape mismatch"
    assert jnp.allclose(spikes.astype(jnp.float32),
                        r_spk.astype(jnp.float32), atol=1e-6), "spike mismatch"
    assert jnp.allclose(mem, r_mem, atol=1e-5, rtol=1e-5), "mem state mismatch"
    assert jnp.allclose(thr, r_thr, atol=1e-5, rtol=1e-5), "thr state mismatch"


if __name__ == "__main__":
    key = jax.random.PRNGKey(0)
    k1, k2, k3 = jax.random.split(key, 3)

    # Case 1: small canonical 4-D input (single N block, single T chunk).
    x1 = jax.random.normal(k1, (2, 4, 16, 16), dtype=jnp.float32) * 1.5
    _check(x1)

    # Case 2: multiple (ragged) N blocks + multiple T chunks, incl. a partial
    # last chunk (dynamic trip count).  Tiny VMEM budget only to force chunking.
    x2 = jax.random.normal(k2, (3, 3, 384, 44), dtype=jnp.float32) * 1.5
    _check(x2, vmem_block_budget=64 * 1024)

    # Case 3: 3-D input (implicit single time step) with non-lane-aligned N.
    x3 = jax.random.normal(k3, (2, 5, 11), dtype=jnp.float32) * 1.5
    _check(x3)

    print("KERNEL_OK")
</pallas_src>

<mosaic_0001>
module attributes {stable_mosaic.version = 11 : i64} {
  func.func @kernel(%arg0: i32, %arg1: i32, %arg2: memref<16x1x128xf32, #tpu.memory_space<vmem>>, %arg3: memref<16x1x128xf32, #tpu.memory_space<vmem>>, %arg4: memref<1x128xf32, #tpu.memory_space<vmem>>, %arg5: memref<1x128xf32, #tpu.memory_space<vmem>>) attributes {dimension_semantics = [#tpu.dimension_semantics<parallel>, #tpu.dimension_semantics<arbitrary>], iteration_bounds = array<i64: 1, 1>, scalar_prefetch = 0 : i64, scratch_operands = 0 : i64, tpu.core_type = #tpu.core_type<tc>, window_params = [{transform_indices = @transform_0, window_bounds = array<i64: 16, 1, 128>}, {transform_indices = @transform_1, window_bounds = array<i64: 16, 1, 128>}, {transform_indices = @transform_2, window_bounds = array<i64: 1, 128>}, {transform_indices = @transform_3, window_bounds = array<i64: 1, 128>}]} {
    %c0_i32 = arith.constant 0 : i32
    %0 = arith.cmpi eq, %arg1, %c0_i32 : i32
    %1 = arith.extui %0 : i1 to i32
    %c0_i32_0 = arith.constant 0 : i32
    %2 = arith.cmpi ne, %1, %c0_i32_0 : i32
    scf.if %2 {
      %cst_120 = arith.constant 0.000000e+00 : f32
      %327 = vector.broadcast %cst_120 : f32 to vector<1x128xf32>
      %c0_121 = arith.constant 0 : index
      %c0_122 = arith.constant 0 : index
      %328 = vector.load %arg4[%c0_121, %c0_122] : memref<1x128xf32, #tpu.memory_space<vmem>>, vector<1x128xf32>
      tpu.vector_store %arg4[%c0_121, %c0_122], %327 {strides = array<i32>} : memref<1x128xf32, #tpu.memory_space<vmem>>, vector<1x128xf32>,
      %cst_123 = arith.constant 1.000000e+00 : f32
      %329 = vector.broadcast %cst_123 : f32 to vector<1x128xf32>
      %c0_124 = arith.constant 0 : index
      %c0_125 = arith.constant 0 : index
      %330 = vector.load %arg5[%c0_124, %c0_125] : memref<1x128xf32, #tpu.memory_space<vmem>>, vector<1x128xf32>
      tpu.vector_store %arg5[%c0_124, %c0_125], %329 {strides = array<i32>} : memref<1x128xf32, #tpu.memory_space<vmem>>, vector<1x128xf32>,
    } else {
    }
    %c0 = arith.constant 0 : index
    %c0_1 = arith.constant 0 : index
    %3 = vector.load %arg4[%c0, %c0_1] : memref<1x128xf32, #tpu.memory_space<vmem>>, vector<1x128xf32>
    %c0_2 = arith.constant 0 : index
    %c0_3 = arith.constant 0 : index
    %4 = vector.load %arg5[%c0_2, %c0_3] : memref<1x128xf32, #tpu.memory_space<vmem>>, vector<1x128xf32>
    %c0_i32_4 = arith.constant 0 : i32
    %5 = arith.index_cast %c0_i32_4 : i32 to index
    %c0_5 = arith.constant 0 : index
    %c0_6 = arith.constant 0 : index
    %6 = vector.load %arg2[%5, %c0_5, %c0_6] : memref<16x1x128xf32, #tpu.memory_space<vmem>>, vector<1x1x128xf32>
    %7 = vector.shape_cast %6 : vector<1x1x128xf32> to vector<1x128xf32>
    %cst = arith.constant 0.951229453 : f32
    %8 = vector.broadcast %cst : f32 to vector<1x128xf32>
    %9 = arith.mulf %3, %8 : vector<1x128xf32>
    %10 = arith.addf %9, %7 : vector<1x128xf32>
    %11 = arith.cmpf ogt, %10, %4 : vector<1x128xf32>
    %12 = arith.extui %11 : vector<1x128xi1> to vector<1x128xi32>
    %13 = arith.sitofp %12 : vector<1x128xi32> to vector<1x128xf32>
    %14 = arith.mulf %4, %13 : vector<1x128xf32>
    %15 = arith.subf %10, %14 : vector<1x128xf32>
    %cst_7 = arith.constant 0.983471453 : f32
    %16 = vector.broadcast %cst_7 : f32 to vector<1x128xf32>
    %17 = arith.mulf %4, %16 : vector<1x128xf32>
    %cst_8 = arith.constant 1.000000e+00 : f32
    %18 = vector.broadcast %cst_8 : f32 to vector<1x128xf32>
    %19 = arith.mulf %13, %18 : vector<1x128xf32>
    %20 = arith.addf %17, %19 : vector<1x128xf32>
    %21 = arith.index_cast %c0_i32_4 : i32 to index
    %c0_9 = arith.constant 0 : index
    %c0_10 = arith.constant 0 : index
    %22 = vector.load %arg3[%21, %c0_9, %c0_10] : memref<16x1x128xf32, #tpu.memory_space<vmem>>, vector<1x1x128xf32>
    %23 = vector.shape_cast %22 : vector<1x1x128xf32> to vector<1x128xf32>
    %24 = vector.shape_cast %13 : vector<1x128xf32> to vector<1x1x128xf32>
    tpu.vector_store %arg3[%21, %c0_9, %c0_10], %24 {strides = array<i32>} : memref<16x1x128xf32, #tpu.memory_space<vmem>>, vector<1x1x128xf32>,
    %c1_i32 = arith.constant 1 : i32
    %25 = arith.index_cast %c1_i32 : i32 to index
    %c0_11 = arith.constant 0 : index
    %c0_12 = arith.constant 0 : index
    %26 = vector.load %arg2[%25, %c0_11, %c0_12] : memref<16x1x128xf32, #tpu.memory_space<vmem>>, vector<1x1x128xf32>
    %27 = vector.shape_cast %26 : vector<1x1x128xf32> to vector<1x128xf32>
    %cst_13 = arith.constant 0.951229453 : f32
    %28 = vector.broadcast %cst_13 : f32 to vector<1x128xf32>
    %29 = arith.mulf %15, %28 : vector<1x128xf32>
    %30 = arith.addf %29, %27 : vector<1x128xf32>
    %31 = arith.cmpf ogt, %30, %20 : vector<1x128xf32>
    %32 = arith.extui %31 : vector<1x128xi1> to vector<1x128xi32>
    %33 = arith.sitofp %32 : vector<1x128xi32> to vector<1x128xf32>
    %34 = arith.mulf %20, %33 : vector<1x128xf32>
    %35 = arith.subf %30, %34 : vector<1x128xf32>
    %cst_14 = arith.constant 0.983471453 : f32
    %36 = vector.broadcast %cst_14 : f32 to vector<1x128xf32>
    %37 = arith.mulf %20, %36 : vector<1x128xf32>
    %cst_15 = arith.constant 1.000000e+00 : f32
    %38 = vector.broadcast %cst_15 : f32 to vector<1x128xf32>
    %39 = arith.mulf %33, %38 : vector<1x128xf32>
    %40 = arith.addf %37, %39 : vector<1x128xf32>
    %41 = arith.index_cast %c1_i32 : i32 to index
    %c0_16 = arith.constant 0 : index
    %c0_17 = arith.constant 0 : index
    %42 = vector.load %arg3[%41, %c0_16, %c0_17] : memref<16x1x128xf32, #tpu.memory_space<vmem>>, vector<1x1x128xf32>
    %43 = vector.shape_cast %42 : vector<1x1x128xf32> to vector<1x128xf32>
    %44 = vector.shape_cast %33 : vector<1x128xf32> to vector<1x1x128xf32>
    tpu.vector_store %arg3[%41, %c0_16, %c0_17], %44 {strides = array<i32>} : memref<16x1x128xf32, #tpu.memory_space<vmem>>, vector<1x1x128xf32>,
    %c2_i32 = arith.constant 2 : i32
    %45 = arith.index_cast %c2_i32 : i32 to index
    %c0_18 = arith.constant 0 : index
    %c0_19 = arith.constant 0 : index
    %46 = vector.load %arg2[%45, %c0_18, %c0_19] : memref<16x1x128xf32, #tpu.memory_space<vmem>>, vector<1x1x128xf32>
    %47 = vector.shape_cast %46 : vector<1x1x128xf32> to vector<1x128xf32>
    %cst_20 = arith.constant 0.951229453 : f32
    %48 = vector.broadcast %cst_20 : f32 to vector<1x128xf32>
    %49 = arith.mulf %35, %48 : vector<1x128xf32>
    %50 = arith.addf %49, %47 : vector<1x128xf32>
    %51 = arith.cmpf ogt, %50, %40 : vector<1x128xf32>
    %52 = arith.extui %51 : vector<1x128xi1> to vector<1x128xi32>
    %53 = arith.sitofp %52 : vector<1x128xi32> to vector<1x128xf32>
    %54 = arith.mulf %40, %53 : vector<1x128xf32>
    %55 = arith.subf %50, %54 : vector<1x128xf32>
    %cst_21 = arith.constant 0.983471453 : f32
    %56 = vector.broadcast %cst_21 : f32 to vector<1x128xf32>
    %57 = arith.mulf %40, %56 : vector<1x128xf32>
    %cst_22 = arith.constant 1.000000e+00 : f32
    %58 = vector.broadcast %cst_22 : f32 to vector<1x128xf32>
    %59 = arith.mulf %53, %58 : vector<1x128xf32>
    %60 = arith.addf %57, %59 : vector<1x128xf32>
    %61 = arith.index_cast %c2_i32 : i32 to index
    %c0_23 = arith.constant 0 : index
    %c0_24 = arith.constant 0 : index
    %62 = vector.load %arg3[%61, %c0_23, %c0_24] : memref<16x1x128xf32, #tpu.memory_space<vmem>>, vector<1x1x128xf32>
    %63 = vector.shape_cast %62 : vector<1x1x128xf32> to vector<1x128xf32>
    %64 = vector.shape_cast %53 : vector<1x128xf32> to vector<1x1x128xf32>
    tpu.vector_store %arg3[%61, %c0_23, %c0_24], %64 {strides = array<i32>} : memref<16x1x128xf32, #tpu.memory_space<vmem>>, vector<1x1x128xf32>,
    %c3_i32 = arith.constant 3 : i32
    %65 = arith.index_cast %c3_i32 : i32 to index
    %c0_25 = arith.constant 0 : index
    %c0_26 = arith.constant 0 : index
    %66 = vector.load %arg2[%65, %c0_25, %c0_26] : memref<16x1x128xf32, #tpu.memory_space<vmem>>, vector<1x1x128xf32>
    %67 = vector.shape_cast %66 : vector<1x1x128xf32> to vector<1x128xf32>
    %cst_27 = arith.constant 0.951229453 : f32
    %68 = vector.broadcast %cst_27 : f32 to vector<1x128xf32>
    %69 = arith.mulf %55, %68 : vector<1x128xf32>
    %70 = arith.addf %69, %67 : vector<1x128xf32>
    %71 = arith.cmpf ogt, %70, %60 : vector<1x128xf32>
    %72 = arith.extui %71 : vector<1x128xi1> to vector<1x128xi32>
    %73 = arith.sitofp %72 : vector<1x128xi32> to vector<1x128xf32>
    %74 = arith.mulf %60, %73 : vector<1x128xf32>
    %75 = arith.subf %70, %74 : vector<1x128xf32>
    %cst_28 = arith.constant 0.983471453 : f32
    %76 = vector.broadcast %cst_28 : f32 to vector<1x128xf32>
    %77 = arith.mulf %60, %76 : vector<1x128xf32>
    %cst_29 = arith.constant 1.000000e+00 : f32
    %78 = vector.broadcast %cst_29 : f32 to vector<1x128xf32>
    %79 = arith.mulf %73, %78 : vector<1x128xf32>
    %80 = arith.addf %77, %79 : vector<1x128xf32>
    %81 = arith.index_cast %c3_i32 : i32 to index
    %c0_30 = arith.constant 0 : index
    %c0_31 = arith.constant 0 : index
    %82 = vector.load %arg3[%81, %c0_30, %c0_31] : memref<16x1x128xf32, #tpu.memory_space<vmem>>, vector<1x1x128xf32>
    %83 = vector.shape_cast %82 : vector<1x1x128xf32> to vector<1x128xf32>
    %84 = vector.shape_cast %73 : vector<1x128xf32> to vector<1x1x128xf32>
    tpu.vector_store %arg3[%81, %c0_30, %c0_31], %84 {strides = array<i32>} : memref<16x1x128xf32, #tpu.memory_space<vmem>>, vector<1x1x128xf32>,
    %c4_i32 = arith.constant 4 : i32
    %85 = arith.index_cast %c4_i32 : i32 to index
    %c0_32 = arith.constant 0 : index
    %c0_33 = arith.constant 0 : index
    %86 = vector.load %arg2[%85, %c0_32, %c0_33] : memref<16x1x128xf32, #tpu.memory_space<vmem>>, vector<1x1x128xf32>
    %87 = vector.shape_cast %86 : vector<1x1x128xf32> to vector<1x128xf32>
    %cst_34 = arith.constant 0.951229453 : f32
    %88 = vector.broadcast %cst_34 : f32 to vector<1x128xf32>
    %89 = arith.mulf %75, %88 : vector<1x128xf32>
    %90 = arith.addf %89, %87 : vector<1x128xf32>
    %91 = arith.cmpf ogt, %90, %80 : vector<1x128xf32>
    %92 = arith.extui %91 : vector<1x128xi1> to vector<1x128xi32>
    %93 = arith.sitofp %92 : vector<1x128xi32> to vector<1x128xf32>
    %94 = arith.mulf %80, %93 : vector<1x128xf32>
    %95 = arith.subf %90, %94 : vector<1x128xf32>
    %cst_35 = arith.constant 0.983471453 : f32
    %96 = vector.broadcast %cst_35 : f32 to vector<1x128xf32>
    %97 = arith.mulf %80, %96 : vector<1x128xf32>
    %cst_36 = arith.constant 1.000000e+00 : f32
    %98 = vector.broadcast %cst_36 : f32 to vector<1x128xf32>
    %99 = arith.mulf %93, %98 : vector<1x128xf32>
    %100 = arith.addf %97, %99 : vector<1x128xf32>
    %101 = arith.index_cast %c4_i32 : i32 to index
    %c0_37 = arith.constant 0 : index
    %c0_38 = arith.constant 0 : index
    %102 = vector.load %arg3[%101, %c0_37, %c0_38] : memref<16x1x128xf32, #tpu.memory_space<vmem>>, vector<1x1x128xf32>
    %103 = vector.shape_cast %102 : vector<1x1x128xf32> to vector<1x128xf32>
    %104 = vector.shape_cast %93 : vector<1x128xf32> to vector<1x1x128xf32>
    tpu.vector_store %arg3[%101, %c0_37, %c0_38], %104 {strides = array<i32>} : memref<16x1x128xf32, #tpu.memory_space<vmem>>, vector<1x1x128xf32>,
    %c5_i32 = arith.constant 5 : i32
    %105 = arith.index_cast %c5_i32 : i32 to index
    %c0_39 = arith.constant 0 : index
    %c0_40 = arith.constant 0 : index
    %106 = vector.load %arg2[%105, %c0_39, %c0_40] : memref<16x1x128xf32, #tpu.memory_space<vmem>>, vector<1x1x128xf32>
    %107 = vector.shape_cast %106 : vector<1x1x128xf32> to vector<1x128xf32>
    %cst_41 = arith.constant 0.951229453 : f32
    %108 = vector.broadcast %cst_41 : f32 to vector<1x128xf32>
    %109 = arith.mulf %95, %108 : vector<1x128xf32>
    %110 = arith.addf %109, %107 : vector<1x128xf32>
    %111 = arith.cmpf ogt, %110, %100 : vector<1x128xf32>
    %112 = arith.extui %111 : vector<1x128xi1> to vector<1x128xi32>
    %113 = arith.sitofp %112 : vector<1x128xi32> to vector<1x128xf32>
    %114 = arith.mulf %100, %113 : vector<1x128xf32>
    %115 = arith.subf %110, %114 : vector<1x128xf32>
    %cst_42 = arith.constant 0.983471453 : f32
    %116 = vector.broadcast %cst_42 : f32 to vector<1x128xf32>
    %117 = arith.mulf %100, %116 : vector<1x128xf32>
    %cst_43 = arith.constant 1.000000e+00 : f32
    %118 = vector.broadcast %cst_43 : f32 to vector<1x128xf32>
    %119 = arith.mulf %113, %118 : vector<1x128xf32>
    %120 = arith.addf %117, %119 : vector<1x128xf32>
    %121 = arith.index_cast %c5_i32 : i32 to index
    %c0_44 = arith.constant 0 : index
    %c0_45 = arith.constant 0 : index
    %122 = vector.load %arg3[%121, %c0_44, %c0_45] : memref<16x1x128xf32, #tpu.memory_space<vmem>>, vector<1x1x128xf32>
    %123 = vector.shape_cast %122 : vector<1x1x128xf32> to vector<1x128xf32>
    %124 = vector.shape_cast %113 : vector<1x128xf32> to vector<1x1x128xf32>
    tpu.vector_store %arg3[%121, %c0_44, %c0_45], %124 {strides = array<i32>} : memref<16x1x128xf32, #tpu.memory_space<vmem>>, vector<1x1x128xf32>,
    %c6_i32 = arith.constant 6 : i32
    %125 = arith.index_cast %c6_i32 : i32 to index
    %c0_46 = arith.constant 0 : index
    %c0_47 = arith.constant 0 : index
    %126 = vector.load %arg2[%125, %c0_46, %c0_47] : memref<16x1x128xf32, #tpu.memory_space<vmem>>, vector<1x1x128xf32>
    %127 = vector.shape_cast %126 : vector<1x1x128xf32> to vector<1x128xf32>
    %cst_48 = arith.constant 0.951229453 : f32
    %128 = vector.broadcast %cst_48 : f32 to vector<1x128xf32>
    %129 = arith.mulf %115, %128 : vector<1x128xf32>
    %130 = arith.addf %129, %127 : vector<1x128xf32>
    %131 = arith.cmpf ogt, %130, %120 : vector<1x128xf32>
    %132 = arith.extui %131 : vector<1x128xi1> to vector<1x128xi32>
    %133 = arith.sitofp %132 : vector<1x128xi32> to vector<1x128xf32>
    %134 = arith.mulf %120, %133 : vector<1x128xf32>
    %135 = arith.subf %130, %134 : vector<1x128xf32>
    %cst_49 = arith.constant 0.983471453 : f32
    %136 = vector.broadcast %cst_49 : f32 to vector<1x128xf32>
    %137 = arith.mulf %120, %136 : vector<1x128xf32>
    %cst_50 = arith.constant 1.000000e+00 : f32
    %138 = vector.broadcast %cst_50 : f32 to vector<1x128xf32>
    %139 = arith.mulf %133, %138 : vector<1x128xf32>
    %140 = arith.addf %137, %139 : vector<1x128xf32>
    %141 = arith.index_cast %c6_i32 : i32 to index
    %c0_51 = arith.constant 0 : index
    %c0_52 = arith.constant 0 : index
    %142 = vector.load %arg3[%141, %c0_51, %c0_52] : memref<16x1x128xf32, #tpu.memory_space<vmem>>, vector<1x1x128xf32>
    %143 = vector.shape_cast %142 : vector<1x1x128xf32> to vector<1x128xf32>
    %144 = vector.shape_cast %133 : vector<1x128xf32> to vector<1x1x128xf32>
    tpu.vector_store %arg3[%141, %c0_51, %c0_52], %144 {strides = array<i32>} : memref<16x1x128xf32, #tpu.memory_space<vmem>>, vector<1x1x128xf32>,
    %c7_i32 = arith.constant 7 : i32
    %145 = arith.index_cast %c7_i32 : i32 to index
    %c0_53 = arith.constant 0 : index
    %c0_54 = arith.constant 0 : index
    %146 = vector.load %arg2[%145, %c0_53, %c0_54] : memref<16x1x128xf32, #tpu.memory_space<vmem>>, vector<1x1x128xf32>
    %147 = vector.shape_cast %146 : vector<1x1x128xf32> to vector<1x128xf32>
    %cst_55 = arith.constant 0.951229453 : f32
    %148 = vector.broadcast %cst_55 : f32 to vector<1x128xf32>
    %149 = arith.mulf %135, %148 : vector<1x128xf32>
    %150 = arith.addf %149, %147 : vector<1x128xf32>
    %151 = arith.cmpf ogt, %150, %140 : vector<1x128xf32>
    %152 = arith.extui %151 : vector<1x128xi1> to vector<1x128xi32>
    %153 = arith.sitofp %152 : vector<1x128xi32> to vector<1x128xf32>
    %154 = arith.mulf %140, %153 : vector<1x128xf32>
    %155 = arith.subf %150, %154 : vector<1x128xf32>
    %cst_56 = arith.constant 0.983471453 : f32
    %156 = vector.broadcast %cst_56 : f32 to vector<1x128xf32>
    %157 = arith.mulf %140, %156 : vector<1x128xf32>
    %cst_57 = arith.constant 1.000000e+00 : f32
    %158 = vector.broadcast %cst_57 : f32 to vector<1x128xf32>
    %159 = arith.mulf %153, %158 : vector<1x128xf32>
    %160 = arith.addf %157, %159 : vector<1x128xf32>
    %161 = arith.index_cast %c7_i32 : i32 to index
    %c0_58 = arith.constant 0 : index
    %c0_59 = arith.constant 0 : index
    %162 = vector.load %arg3[%161, %c0_58, %c0_59] : memref<16x1x128xf32, #tpu.memory_space<vmem>>, vector<1x1x128xf32>
    %163 = vector.shape_cast %162 : vector<1x1x128xf32> to vector<1x128xf32>
    %164 = vector.shape_cast %153 : vector<1x128xf32> to vector<1x1x128xf32>
    tpu.vector_store %arg3[%161, %c0_58, %c0_59], %164 {strides = array<i32>} : memref<16x1x128xf32, #tpu.memory_space<vmem>>, vector<1x1x128xf32>,
    %c8_i32 = arith.constant 8 : i32
    %165 = arith.index_cast %c8_i32 : i32 to index
    %c0_60 = arith.constant 0 : index
    %c0_61 = arith.constant 0 : index
    %166 = vector.load %arg2[%165, %c0_60, %c0_61] : memref<16x1x128xf32, #tpu.memory_space<vmem>>, vector<1x1x128xf32>
    %167 = vector.shape_cast %166 : vector<1x1x128xf32> to vector<1x128xf32>
    %cst_62 = arith.constant 0.951229453 : f32
    %168 = vector.broadcast %cst_62 : f32 to vector<1x128xf32>
    %169 = arith.mulf %155, %168 : vector<1x128xf32>
    %170 = arith.addf %169, %167 : vector<1x128xf32>
    %171 = arith.cmpf ogt, %170, %160 : vector<1x128xf32>
    %172 = arith.extui %171 : vector<1x128xi1> to vector<1x128xi32>
    %173 = arith.sitofp %172 : vector<1x128xi32> to vector<1x128xf32>
    %174 = arith.mulf %160, %173 : vector<1x128xf32>
    %175 = arith.subf %170, %174 : vector<1x128xf32>
    %cst_63 = arith.constant 0.983471453 : f32
    %176 = vector.broadcast %cst_63 : f32 to vector<1x128xf32>
    %177 = arith.mulf %160, %176 : vector<1x128xf32>
    %cst_64 = arith.constant 1.000000e+00 : f32
    %178 = vector.broadcast %cst_64 : f32 to vector<1x128xf32>
    %179 = arith.mulf %173, %178 : vector<1x128xf32>
    %180 = arith.addf %177, %179 : vector<1x128xf32>
    %181 = arith.index_cast %c8_i32 : i32 to index
    %c0_65 = arith.constant 0 : index
    %c0_66 = arith.constant 0 : index
    %182 = vector.load %arg3[%181, %c0_65, %c0_66] : memref<16x1x128xf32, #tpu.memory_space<vmem>>, vector<1x1x128xf32>
    %183 = vector.shape_cast %182 : vector<1x1x128xf32> to vector<1x128xf32>
    %184 = vector.shape_cast %173 : vector<1x128xf32> to vector<1x1x128xf32>
    tpu.vector_store %arg3[%181, %c0_65, %c0_66], %184 {strides = array<i32>} : memref<16x1x128xf32, #tpu.memory_space<vmem>>, vector<1x1x128xf32>,
    %c9_i32 = arith.constant 9 : i32
    %185 = arith.index_cast %c9_i32 : i32 to index
    %c0_67 = arith.constant 0 : index
    %c0_68 = arith.constant 0 : index
    %186 = vector.load %arg2[%185, %c0_67, %c0_68] : memref<16x1x128xf32, #tpu.memory_space<vmem>>, vector<1x1x128xf32>
    %187 = vector.shape_cast %186 : vector<1x1x128xf32> to vector<1x128xf32>
    %cst_69 = arith.constant 0.951229453 : f32
    %188 = vector.broadcast %cst_69 : f32 to vector<1x128xf32>
    %189 = arith.mulf %175, %188 : vector<1x128xf32>
    %190 = arith.addf %189, %187 : vector<1x128xf32>
    %191 = arith.cmpf ogt, %190, %180 : vector<1x128xf32>
    %192 = arith.extui %191 : vector<1x128xi1> to vector<1x128xi32>
    %193 = arith.sitofp %192 : vector<1x128xi32> to vector<1x128xf32>
    %194 = arith.mulf %180, %193 : vector<1x128xf32>
    %195 = arith.subf %190, %194 : vector<1x128xf32>
    %cst_70 = arith.constant 0.983471453 : f32
    %196 = vector.broadcast %cst_70 : f32 to vector<1x128xf32>
    %197 = arith.mulf %180, %196 : vector<1x128xf32>
    %cst_71 = arith.constant 1.000000e+00 : f32
    %198 = vector.broadcast %cst_71 : f32 to vector<1x128xf32>
    %199 = arith.mulf %193, %198 : vector<1x128xf32>
    %200 = arith.addf %197, %199 : vector<1x128xf32>
    %201 = arith.index_cast %c9_i32 : i32 to index
    %c0_72 = arith.constant 0 : index
    %c0_73 = arith.constant 0 : index
    %202 = vector.load %arg3[%201, %c0_72, %c0_73] : memref<16x1x128xf32, #tpu.memory_space<vmem>>, vector<1x1x128xf32>
    %203 = vector.shape_cast %202 : vector<1x1x128xf32> to vector<1x128xf32>
    %204 = vector.shape_cast %193 : vector<1x128xf32> to vector<1x1x128xf32>
    tpu.vector_store %arg3[%201, %c0_72, %c0_73], %204 {strides = array<i32>} : memref<16x1x128xf32, #tpu.memory_space<vmem>>, vector<1x1x128xf32>,
    %c10_i32 = arith.constant 10 : i32
    %205 = arith.index_cast %c10_i32 : i32 to index
    %c0_74 = arith.constant 0 : index
    %c0_75 = arith.constant 0 : index
    %206 = vector.load %arg2[%205, %c0_74, %c0_75] : memref<16x1x128xf32, #tpu.memory_space<vmem>>, vector<1x1x128xf32>
    %207 = vector.shape_cast %206 : vector<1x1x128xf32> to vector<1x128xf32>
    %cst_76 = arith.constant 0.951229453 : f32
    %208 = vector.broadcast %cst_76 : f32 to vector<1x128xf32>
    %209 = arith.mulf %195, %208 : vector<1x128xf32>
    %210 = arith.addf %209, %207 : vector<1x128xf32>
    %211 = arith.cmpf ogt, %210, %200 : vector<1x128xf32>
    %212 = arith.extui %211 : vector<1x128xi1> to vector<1x128xi32>
    %213 = arith.sitofp %212 : vector<1x128xi32> to vector<1x128xf32>
    %214 = arith.mulf %200, %213 : vector<1x128xf32>
    %215 = arith.subf %210, %214 : vector<1x128xf32>
    %cst_77 = arith.constant 0.983471453 : f32
    %216 = vector.broadcast %cst_77 : f32 to vector<1x128xf32>
    %217 = arith.mulf %200, %216 : vector<1x128xf32>
    %cst_78 = arith.constant 1.000000e+00 : f32
    %218 = vector.broadcast %cst_78 : f32 to vector<1x128xf32>
    %219 = arith.mulf %213, %218 : vector<1x128xf32>
    %220 = arith.addf %217, %219 : vector<1x128xf32>
    %221 = arith.index_cast %c10_i32 : i32 to index
    %c0_79 = arith.constant 0 : index
    %c0_80 = arith.constant 0 : index
    %222 = vector.load %arg3[%221, %c0_79, %c0_80] : memref<16x1x128xf32, #tpu.memory_space<vmem>>, vector<1x1x128xf32>
    %223 = vector.shape_cast %222 : vector<1x1x128xf32> to vector<1x128xf32>
    %224 = vector.shape_cast %213 : vector<1x128xf32> to vector<1x1x128xf32>
    tpu.vector_store %arg3[%221, %c0_79, %c0_80], %224 {strides = array<i32>} : memref<16x1x128xf32, #tpu.memory_space<vmem>>, vector<1x1x128xf32>,
    %c11_i32 = arith.constant 11 : i32
    %225 = arith.index_cast %c11_i32 : i32 to index
    %c0_81 = arith.constant 0 : index
    %c0_82 = arith.constant 0 : index
    %226 = vector.load %arg2[%225, %c0_81, %c0_82] : memref<16x1x128xf32, #tpu.memory_space<vmem>>, vector<1x1x128xf32>
    %227 = vector.shape_cast %226 : vector<1x1x128xf32> to vector<1x128xf32>
    %cst_83 = arith.constant 0.951229453 : f32
    %228 = vector.broadcast %cst_83 : f32 to vector<1x128xf32>
    %229 = arith.mulf %215, %228 : vector<1x128xf32>
    %230 = arith.addf %229, %227 : vector<1x128xf32>
    %231 = arith.cmpf ogt, %230, %220 : vector<1x128xf32>
    %232 = arith.extui %231 : vector<1x128xi1> to vector<1x128xi32>
    %233 = arith.sitofp %232 : vector<1x128xi32> to vector<1x128xf32>
    %234 = arith.mulf %220, %233 : vector<1x128xf32>
    %235 = arith.subf %230, %234 : vector<1x128xf32>
    %cst_84 = arith.constant 0.983471453 : f32
    %236 = vector.broadcast %cst_84 : f32 to vector<1x128xf32>
    %237 = arith.mulf %220, %236 : vector<1x128xf32>
    %cst_85 = arith.constant 1.000000e+00 : f32
    %238 = vector.broadcast %cst_85 : f32 to vector<1x128xf32>
    %239 = arith.mulf %233, %238 : vector<1x128xf32>
    %240 = arith.addf %237, %239 : vector<1x128xf32>
    %241 = arith.index_cast %c11_i32 : i32 to index
    %c0_86 = arith.constant 0 : index
    %c0_87 = arith.constant 0 : index
    %242 = vector.load %arg3[%241, %c0_86, %c0_87] : memref<16x1x128xf32, #tpu.memory_space<vmem>>, vector<1x1x128xf32>
    %243 = vector.shape_cast %242 : vector<1x1x128xf32> to vector<1x128xf32>
    %244 = vector.shape_cast %233 : vector<1x128xf32> to vector<1x1x128xf32>
    tpu.vector_store %arg3[%241, %c0_86, %c0_87], %244 {strides = array<i32>} : memref<16x1x128xf32, #tpu.memory_space<vmem>>, vector<1x1x128xf32>,
    %c12_i32 = arith.constant 12 : i32
    %245 = arith.index_cast %c12_i32 : i32 to index
    %c0_88 = arith.constant 0 : index
    %c0_89 = arith.constant 0 : index
    %246 = vector.load %arg2[%245, %c0_88, %c0_89] : memref<16x1x128xf32, #tpu.memory_space<vmem>>, vector<1x1x128xf32>
    %247 = vector.shape_cast %246 : vector<1x1x128xf32> to vector<1x128xf32>
    %cst_90 = arith.constant 0.951229453 : f32
    %248 = vector.broadcast %cst_90 : f32 to vector<1x128xf32>
    %249 = arith.mulf %235, %248 : vector<1x128xf32>
    %250 = arith.addf %249, %247 : vector<1x128xf32>
    %251 = arith.cmpf ogt, %250, %240 : vector<1x128xf32>
    %252 = arith.extui %251 : vector<1x128xi1> to vector<1x128xi32>
    %253 = arith.sitofp %252 : vector<1x128xi32> to vector<1x128xf32>
    %254 = arith.mulf %240, %253 : vector<1x128xf32>
    %255 = arith.subf %250, %254 : vector<1x128xf32>
    %cst_91 = arith.constant 0.983471453 : f32
    %256 = vector.broadcast %cst_91 : f32 to vector<1x128xf32>
    %257 = arith.mulf %240, %256 : vector<1x128xf32>
    %cst_92 = arith.constant 1.000000e+00 : f32
    %258 = vector.broadcast %cst_92 : f32 to vector<1x128xf32>
    %259 = arith.mulf %253, %258 : vector<1x128xf32>
    %260 = arith.addf %257, %259 : vector<1x128xf32>
    %261 = arith.index_cast %c12_i32 : i32 to index
    %c0_93 = arith.constant 0 : index
    %c0_94 = arith.constant 0 : index
    %262 = vector.load %arg3[%261, %c0_93, %c0_94] : memref<16x1x128xf32, #tpu.memory_space<vmem>>, vector<1x1x128xf32>
    %263 = vector.shape_cast %262 : vector<1x1x128xf32> to vector<1x128xf32>
    %264 = vector.shape_cast %253 : vector<1x128xf32> to vector<1x1x128xf32>
    tpu.vector_store %arg3[%261, %c0_93, %c0_94], %264 {strides = array<i32>} : memref<16x1x128xf32, #tpu.memory_space<vmem>>, vector<1x1x128xf32>,
    %c13_i32 = arith.constant 13 : i32
    %265 = arith.index_cast %c13_i32 : i32 to index
    %c0_95 = arith.constant 0 : index
    %c0_96 = arith.constant 0 : index
    %266 = vector.load %arg2[%265, %c0_95, %c0_96] : memref<16x1x128xf32, #tpu.memory_space<vmem>>, vector<1x1x128xf32>
    %267 = vector.shape_cast %266 : vector<1x1x128xf32> to vector<1x128xf32>
    %cst_97 = arith.constant 0.951229453 : f32
    %268 = vector.broadcast %cst_97 : f32 to vector<1x128xf32>
    %269 = arith.mulf %255, %268 : vector<1x128xf32>
    %270 = arith.addf %269, %267 : vector<1x128xf32>
    %271 = arith.cmpf ogt, %270, %260 : vector<1x128xf32>
    %272 = arith.extui %271 : vector<1x128xi1> to vector<1x128xi32>
    %273 = arith.sitofp %272 : vector<1x128xi32> to vector<1x128xf32>
    %274 = arith.mulf %260, %273 : vector<1x128xf32>
    %275 = arith.subf %270, %274 : vector<1x128xf32>
    %cst_98 = arith.constant 0.983471453 : f32
    %276 = vector.broadcast %cst_98 : f32 to vector<1x128xf32>
    %277 = arith.mulf %260, %276 : vector<1x128xf32>
    %cst_99 = arith.constant 1.000000e+00 : f32
    %278 = vector.broadcast %cst_99 : f32 to vector<1x128xf32>
    %279 = arith.mulf %273, %278 : vector<1x128xf32>
    %280 = arith.addf %277, %279 : vector<1x128xf32>
    %281 = arith.index_cast %c13_i32 : i32 to index
    %c0_100 = arith.constant 0 : index
    %c0_101 = arith.constant 0 : index
    %282 = vector.load %arg3[%281, %c0_100, %c0_101] : memref<16x1x128xf32, #tpu.memory_space<vmem>>, vector<1x1x128xf32>
    %283 = vector.shape_cast %282 : vector<1x1x128xf32> to vector<1x128xf32>
    %284 = vector.shape_cast %273 : vector<1x128xf32> to vector<1x1x128xf32>
    tpu.vector_store %arg3[%281, %c0_100, %c0_101], %284 {strides = array<i32>} : memref<16x1x128xf32, #tpu.memory_space<vmem>>, vector<1x1x128xf32>,
    %c14_i32 = arith.constant 14 : i32
    %285 = arith.index_cast %c14_i32 : i32 to index
    %c0_102 = arith.constant 0 : index
    %c0_103 = arith.constant 0 : index
    %286 = vector.load %arg2[%285, %c0_102, %c0_103] : memref<16x1x128xf32, #tpu.memory_space<vmem>>, vector<1x1x128xf32>
    %287 = vector.shape_cast %286 : vector<1x1x128xf32> to vector<1x128xf32>
    %cst_104 = arith.constant 0.951229453 : f32
    %288 = vector.broadcast %cst_104 : f32 to vector<1x128xf32>
    %289 = arith.mulf %275, %288 : vector<1x128xf32>
    %290 = arith.addf %289, %287 : vector<1x128xf32>
    %291 = arith.cmpf ogt, %290, %280 : vector<1x128xf32>
    %292 = arith.extui %291 : vector<1x128xi1> to vector<1x128xi32>
    %293 = arith.sitofp %292 : vector<1x128xi32> to vector<1x128xf32>
    %294 = arith.mulf %280, %293 : vector<1x128xf32>
    %295 = arith.subf %290, %294 : vector<1x128xf32>
    %cst_105 = arith.constant 0.983471453 : f32
    %296 = vector.broadcast %cst_105 : f32 to vector<1x128xf32>
    %297 = arith.mulf %280, %296 : vector<1x128xf32>
    %cst_106 = arith.constant 1.000000e+00 : f32
    %298 = vector.broadcast %cst_106 : f32 to vector<1x128xf32>
    %299 = arith.mulf %293, %298 : vector<1x128xf32>
    %300 = arith.addf %297, %299 : vector<1x128xf32>
    %301 = arith.index_cast %c14_i32 : i32 to index
    %c0_107 = arith.constant 0 : index
    %c0_108 = arith.constant 0 : index
    %302 = vector.load %arg3[%301, %c0_107, %c0_108] : memref<16x1x128xf32, #tpu.memory_space<vmem>>, vector<1x1x128xf32>
    %303 = vector.shape_cast %302 : vector<1x1x128xf32> to vector<1x128xf32>
    %304 = vector.shape_cast %293 : vector<1x128xf32> to vector<1x1x128xf32>
    tpu.vector_store %arg3[%301, %c0_107, %c0_108], %304 {strides = array<i32>} : memref<16x1x128xf32, #tpu.memory_space<vmem>>, vector<1x1x128xf32>,
    %c15_i32 = arith.constant 15 : i32
    %305 = arith.index_cast %c15_i32 : i32 to index
    %c0_109 = arith.constant 0 : index
    %c0_110 = arith.constant 0 : index
    %306 = vector.load %arg2[%305, %c0_109, %c0_110] : memref<16x1x128xf32, #tpu.memory_space<vmem>>, vector<1x1x128xf32>
    %307 = vector.shape_cast %306 : vector<1x1x128xf32> to vector<1x128xf32>
    %cst_111 = arith.constant 0.951229453 : f32
    %308 = vector.broadcast %cst_111 : f32 to vector<1x128xf32>
    %309 = arith.mulf %295, %308 : vector<1x128xf32>
    %310 = arith.addf %309, %307 : vector<1x128xf32>
    %311 = arith.cmpf ogt, %310, %300 : vector<1x128xf32>
    %312 = arith.extui %311 : vector<1x128xi1> to vector<1x128xi32>
    %313 = arith.sitofp %312 : vector<1x128xi32> to vector<1x128xf32>
    %314 = arith.mulf %300, %313 : vector<1x128xf32>
    %315 = arith.subf %310, %314 : vector<1x128xf32>
    %cst_112 = arith.constant 0.983471453 : f32
    %316 = vector.broadcast %cst_112 : f32 to vector<1x128xf32>
    %317 = arith.mulf %300, %316 : vector<1x128xf32>
    %cst_113 = arith.constant 1.000000e+00 : f32
    %318 = vector.broadcast %cst_113 : f32 to vector<1x128xf32>
    %319 = arith.mulf %313, %318 : vector<1x128xf32>
    %320 = arith.addf %317, %319 : vector<1x128xf32>
    %321 = arith.index_cast %c15_i32 : i32 to index
    %c0_114 = arith.constant 0 : index
    %c0_115 = arith.constant 0 : index
    %322 = vector.load %arg3[%321, %c0_114, %c0_115] : memref<16x1x128xf32, #tpu.memory_space<vmem>>, vector<1x1x128xf32>
    %323 = vector.shape_cast %322 : vector<1x1x128xf32> to vector<1x128xf32>
    %324 = vector.shape_cast %313 : vector<1x128xf32> to vector<1x1x128xf32>
    tpu.vector_store %arg3[%321, %c0_114, %c0_115], %324 {strides = array<i32>} : memref<16x1x128xf32, #tpu.memory_space<vmem>>, vector<1x1x128xf32>,
    %c16_i32 = arith.constant 16 : i32
    %c0_116 = arith.constant 0 : index
    %c0_117 = arith.constant 0 : index
    %325 = vector.load %arg4[%c0_116, %c0_117] : memref<1x128xf32, #tpu.memory_space<vmem>>, vector<1x128xf32>
    tpu.vector_store %arg4[%c0_116, %c0_117], %315 {strides = array<i32>} : memref<1x128xf32, #tpu.memory_space<vmem>>, vector<1x128xf32>,
    %c0_118 = arith.constant 0 : index
    %c0_119 = arith.constant 0 : index
    %326 = vector.load %arg5[%c0_118, %c0_119] : memref<1x128xf32, #tpu.memory_space<vmem>>, vector<1x128xf32>
    tpu.vector_store %arg5[%c0_118, %c0_119], %320 {strides = array<i32>} : memref<1x128xf32, #tpu.memory_space<vmem>>, vector<1x128xf32>,
    return
  }
  func.func @transform_0(%arg0: i32, %arg1: i32) -> (i32, i32, i32) {
    %c0_i32 = arith.constant 0 : i32
    %c0_i32_0 = arith.constant 0 : i32
    return %arg1, %arg0, %c0_i32 : i32, i32, i32
  }
  func.func @transform_1(%arg0: i32, %arg1: i32) -> (i32, i32, i32) {
    %c0_i32 = arith.constant 0 : i32
    %c0_i32_0 = arith.constant 0 : i32
    return %arg1, %arg0, %c0_i32 : i32, i32, i32
  }
  func.func @transform_2(%arg0: i32, %arg1: i32) -> (i32, i32) {
    %c0_i32 = arith.constant 0 : i32
    %c0_i32_0 = arith.constant 0 : i32
    return %arg0, %c0_i32 : i32, i32
  }
  func.func @transform_3(%arg0: i32, %arg1: i32) -> (i32, i32) {
    %c0_i32 = arith.constant 0 : i32
    %c0_i32_0 = arith.constant 0 : i32
    return %arg0, %c0_i32 : i32, i32
  }
}

</mosaic_0001>

<bundles_post_ra>
// kernel: tpu_custom_call.1
= control target key start
LH: loop header
LB: loop body
LE: loop exit
PB: predicated region body
PF: predicated region fallthrough
CT: control target
= control target key end

     0   :  { %9 = vsyncpa [#allocation3], 0  ;;  %s512_s0 = inlined_call_operand.hbm [shape: f32[16,1,128], index: 0, kind: input, shape index: {}]   ;;  %s513_s1 = inlined_call_operand.hbm [shape: f32[16,1,128], index: 1, kind: output, shape index: {0}]   ;;  %s514_s2 = inlined_call_operand.hbm [shape: f32[1,128], index: 2, kind: output, shape index: {1}]   ;;  %s515_s3 = inlined_call_operand.hbm [shape: f32[1,128], index: 3, kind: output, shape index: {2}]  }
   0x1   :  { %10 = vsyncpa [#allocation4], 0 }
   0x2   :  { %11 = vsyncpa [#allocation7], 0  ;;  %s405_s12 = smov [#allocation2]   ;;  %s311_s16 = scalar_lea.hbm %s512_s0, 256 }
   0x3   :  { %s17_s13 = sshll.u32 %s405_s12, 4  ;;  %p312_p0 = scmp.ne.s32.totalorder %s512_s0, %s311_s16  ;;  %s18_s13 = int_to_ptr.vmem [resolvable:$true] %s17_s13 }
   0x4   :  { %p315_p1 = scmp.lt.u32.totalorder %s311_s16, %s512_s0 }
   0x6   :  { %p317_p2 = pnand %p315_p1, %p312_p0 }
   0x8   :  { %320 = shalt.err (!%p317_p2)
}
   0x9   :  { %s321_s21 = scalar_lea.vmem %s18_s13, 256  ;;  %p326_p4 = scmp.lt.s32.totalorder %s18_s13, %s18_s13 }
   0xa   :  { %p322_p3 = scmp.ne.s32.totalorder %s18_s13, %s321_s21  ;;  %p327_p5 = scmp.lt.s32.totalorder %s321_s21, %s321_s21 }
   0xc   :  { %p328_p6 = por %p327_p5, %p326_p4 }
   0xe   :  { %p329_p7 = pnand %p328_p6, %p322_p3 }
  0x10   :  { %332 = shalt.err (!%p329_p7)
}
  0x11   :  { %s406_s22 = smov 16   ;;  %s407_s23 = smov 1  }
  0x12   :  { %23 = dma.hbm_to_vmem [thread:$0]  %s512_s0, 256, %s18_s13, [#allocation3], %s406_s22, %s406_s22, %s407_s23  }
  0x13   :  { %399 = dma.done.wait [#allocation3], 256  }
  0x14   :  { %400 = vsyncadd [#allocation3], 4294967040  ;;  %v408_v0 = vmov 0.0   ;;  %v409_v1 = vmov 1.0   ;;  %v35_v3 = vld [vmem:[#allocation2] sm:$0x1] }
  0x15   :  { %31 = vst [vmem:[#allocation6] sm:$0x1] %v408_v0  ;;  %32 = vst [vmem:[#allocation8] sm:$0x1] %v409_v1  ;;  %v47_v11 = vld [vmem:[#allocation2 + $0x1] sm:$0x1] }
  0x16   :  { %v60_v18 = vld [vmem:[#allocation2 + $0x2] sm:$0x1]  ;;  %v73_v26 = vld [vmem:[#allocation2 + $0x3] sm:$0x1]  ;;  %v86_v34 = vld [vmem:[#allocation2 + $0x4] sm:$0x1] }
  0x17   :  { %v99_v42 = vld [vmem:[#allocation2 + $0x5] sm:$0x1]  ;;  %v112_v50 = vld [vmem:[#allocation2 + $0x6] sm:$0x1]  ;;  %v125_v58 = vld [vmem:[#allocation2 + $0x7] sm:$0x1] }
  0x18   :  { %s410_s0 = smov [#allocation5]   ;;  %s411_s27 = smov [#allocation6]  }
  0x19   :  { %s248_s26 = sshll.u32 %s410_s0, 4  ;;  %s261_s28 = sshll.u32 %s411_s27, 4  ;;  %s249_s26 = int_to_ptr.vmem [resolvable:$true] %s248_s26  ;;  %s262_s28 = int_to_ptr.vmem [resolvable:$true] %s261_s28 }
  0x1a   :  { %s412_s29 = smov [#allocation8]   ;;  %s333_s4 = scalar_lea.vmem %s249_s26, 256 }
  0x1b   :  { %s271_s30 = sshll.u32 %s412_s29, 4  ;;  %p334_p8 = scmp.ne.s32.totalorder %s249_s26, %s333_s4  ;;  %s480_s30 = int_to_ptr.vmem [resolvable:$true] %s271_s30 }
  0x1c   :  { %v33_v2 = vld [vmem:[#allocation6] sm:$0x1]  ;;  %v34_v5 = vld [vmem:[#allocation8] sm:$0x1]  ;;  %p338_p9 = scmp.lt.s32.totalorder %s249_s26, %s249_s26  ;;  %p339_p10 = scmp.lt.s32.totalorder %s333_s4, %s333_s4 }
  0x1d   :  { %v36_v4 = vmul.f32 0.95122945, %v33_v2  ;;  %v43_v10 = vmul.f32 0.98347145, %v34_v5 }
  0x1e   :  { %p340_p11 = por %p339_p10, %p338_p9 }
  0x1f   :  { %v37_v6 = vadd.f32 %v36_v4, %v35_v3  ;;  %v138_v3 = vld [vmem:[#allocation2 + $0x8] sm:$0x1] }
  0x20   :  { %p341_p12 = pnand %p340_p11, %p334_p8 }
  0x21   :  { %vm38_vm0 = vcmp.gt.f32.partialorder %v37_v6, %v34_v5 }
  0x22   :  { %v287_v7 = vsel %vm38_vm0, 1.0, %v408_v0 }
  0x23   :  { %v41_v8 = vmul.f32 %v287_v7, %v34_v5  ;;  %45 = vst [vmem:[#allocation5] sm:$0x1] %v287_v7  ;;  %v44_v13 = vadd.f32 %v287_v7, %v43_v10 }
  0x25   :  { %v42_v9 = vsub.f32 %v37_v6, %v41_v8  ;;  %v55_v19 = vmul.f32 0.98347145, %v44_v13 }
  0x27   :  { %v48_v12 = vmul.f32 0.95122945, %v42_v9 }
  0x29   :  { %v49_v14 = vadd.f32 %v48_v12, %v47_v11  ;;  %v151_v11 = vld [vmem:[#allocation2 + $0x9] sm:$0x1] }
  0x2b   :  { %vm50_vm1 = vcmp.gt.f32.partialorder %v49_v14, %v44_v13 }
  0x2c   :  { %v288_v15 = vsel %vm50_vm1, 1.0, %v408_v0 }
  0x2d   :  { %v53_v16 = vmul.f32 %v288_v15, %v44_v13  ;;  %58 = vst [vmem:[#allocation5 + $0x1] sm:$0x1] %v288_v15  ;;  %v56_v21 = vadd.f32 %v288_v15, %v55_v19  ;;  %v164_v19 = vld [vmem:[#allocation2 + $0xa] sm:$0x1] }
  0x2f   :  { %v54_v17 = vsub.f32 %v49_v14, %v53_v16  ;;  %v68_v27 = vmul.f32 0.98347145, %v56_v21 }
  0x31   :  { %v61_v20 = vmul.f32 0.95122945, %v54_v17 }
  0x33   :  { %v62_v22 = vadd.f32 %v61_v20, %v60_v18 }
  0x35   :  { %vm63_vm2 = vcmp.gt.f32.partialorder %v62_v22, %v56_v21 }
  0x36   :  { %v289_v23 = vsel %vm63_vm2, 1.0, %v408_v0 }
  0x37   :  { %v66_v24 = vmul.f32 %v289_v23, %v56_v21  ;;  %71 = vst [vmem:[#allocation5 + $0x2] sm:$0x1] %v289_v23  ;;  %v69_v29 = vadd.f32 %v289_v23, %v68_v27  ;;  %v177_v27 = vld [vmem:[#allocation2 + $0xb] sm:$0x1] }
  0x39   :  { %v67_v25 = vsub.f32 %v62_v22, %v66_v24  ;;  %v81_v35 = vmul.f32 0.98347145, %v69_v29 }
  0x3b   :  { %v74_v28 = vmul.f32 0.95122945, %v67_v25 }
  0x3d   :  { %v75_v30 = vadd.f32 %v74_v28, %v73_v26 }
  0x3f   :  { %vm76_vm3 = vcmp.gt.f32.partialorder %v75_v30, %v69_v29 }
  0x40   :  { %v290_v31 = vsel %vm76_vm3, 1.0, %v408_v0 }
  0x41   :  { %v79_v32 = vmul.f32 %v290_v31, %v69_v29  ;;  %84 = vst [vmem:[#allocation5 + $0x3] sm:$0x1] %v290_v31  ;;  %v82_v37 = vadd.f32 %v290_v31, %v81_v35  ;;  %v190_v35 = vld [vmem:[#allocation2 + $0xc] sm:$0x1] }
  0x43   :  { %v80_v33 = vsub.f32 %v75_v30, %v79_v32  ;;  %v94_v43 = vmul.f32 0.98347145, %v82_v37 }
  0x45   :  { %v87_v36 = vmul.f32 0.95122945, %v80_v33 }
  0x47   :  { %v88_v38 = vadd.f32 %v87_v36, %v86_v34 }
  0x49   :  { %vm89_vm4 = vcmp.gt.f32.partialorder %v88_v38, %v82_v37 }
  0x4a   :  { %v291_v39 = vsel %vm89_vm4, 1.0, %v408_v0 }
  0x4b   :  { %v92_v40 = vmul.f32 %v291_v39, %v82_v37  ;;  %97 = vst [vmem:[#allocation5 + $0x4] sm:$0x1] %v291_v39  ;;  %v95_v45 = vadd.f32 %v291_v39, %v94_v43  ;;  %v203_v43 = vld [vmem:[#allocation2 + $0xd] sm:$0x1] }
  0x4d   :  { %v93_v41 = vsub.f32 %v88_v38, %v92_v40  ;;  %v107_v51 = vmul.f32 0.98347145, %v95_v45 }
  0x4f   :  { %v100_v44 = vmul.f32 0.95122945, %v93_v41 }
  0x51   :  { %v101_v46 = vadd.f32 %v100_v44, %v99_v42 }
  0x53   :  { %vm102_vm5 = vcmp.gt.f32.partialorder %v101_v46, %v95_v45 }
  0x54   :  { %v292_v47 = vsel %vm102_vm5, 1.0, %v408_v0 }
  0x55   :  { %v105_v48 = vmul.f32 %v292_v47, %v95_v45  ;;  %110 = vst [vmem:[#allocation5 + $0x5] sm:$0x1] %v292_v47  ;;  %v108_v53 = vadd.f32 %v292_v47, %v107_v51  ;;  %v216_v51 = vld [vmem:[#allocation2 + $0xe] sm:$0x1] }
  0x57   :  { %v106_v49 = vsub.f32 %v101_v46, %v105_v48  ;;  %v120_v59 = vmul.f32 0.98347145, %v108_v53 }
  0x59   :  { %v113_v52 = vmul.f32 0.95122945, %v106_v49 }
  0x5b   :  { %v114_v54 = vadd.f32 %v113_v52, %v112_v50 }
  0x5d   :  { %vm115_vm6 = vcmp.gt.f32.partialorder %v114_v54, %v108_v53 }
  0x5e   :  { %v293_v55 = vsel %vm115_vm6, 1.0, %v408_v0 }
  0x5f   :  { %v118_v56 = vmul.f32 %v293_v55, %v108_v53  ;;  %123 = vst [vmem:[#allocation5 + $0x6] sm:$0x1] %v293_v55  ;;  %v121_v61 = vadd.f32 %v293_v55, %v120_v59 }
  0x61   :  { %v119_v57 = vsub.f32 %v114_v54, %v118_v56  ;;  %v133_v4 = vmul.f32 0.98347145, %v121_v61 }
  0x63   :  { %v126_v60 = vmul.f32 0.95122945, %v119_v57 }
  0x65   :  { %v127_v62 = vadd.f32 %v126_v60, %v125_v58  ;;  %v229_v60 = vld [vmem:[#allocation2 + $0xf] sm:$0x1] }
  0x67   :  { %vm128_vm7 = vcmp.gt.f32.partialorder %v127_v62, %v121_v61 }
  0x68   :  { %v294_v63 = vsel %vm128_vm7, 1.0, %v408_v0 }
  0x69   :  { %v131_v1 = vmul.f32 %v294_v63, %v121_v61  ;;  %136 = vst [vmem:[#allocation5 + $0x7] sm:$0x1] %v294_v63  ;;  %v134_v6 = vadd.f32 %v294_v63, %v133_v4 }
  0x6b   :  { %v132_v2 = vsub.f32 %v127_v62, %v131_v1  ;;  %v146_v12 = vmul.f32 0.98347145, %v134_v6 }
  0x6d   :  { %v139_v5 = vmul.f32 0.95122945, %v132_v2 }
  0x6f   :  { %v140_v7 = vadd.f32 %v139_v5, %v138_v3 }
  0x71   :  { %vm141_vm8 = vcmp.gt.f32.partialorder %v140_v7, %v134_v6 }
  0x72   :  { %v295_v8 = vsel %vm141_vm8, 1.0, %v408_v0 }
  0x73   :  { %v144_v9 = vmul.f32 %v295_v8, %v134_v6  ;;  %149 = vst [vmem:[#allocation5 + $0x8] sm:$0x1] %v295_v8  ;;  %v147_v14 = vadd.f32 %v295_v8, %v146_v12 }
  0x75   :  { %v145_v10 = vsub.f32 %v140_v7, %v144_v9  ;;  %v159_v20 = vmul.f32 0.98347145, %v147_v14 }
  0x77   :  { %v152_v13 = vmul.f32 0.95122945, %v145_v10 }
  0x79   :  { %v153_v15 = vadd.f32 %v152_v13, %v151_v11 }
  0x7b   :  { %vm154_vm9 = vcmp.gt.f32.partialorder %v153_v15, %v147_v14 }
  0x7c   :  { %v296_v16 = vsel %vm154_vm9, 1.0, %v408_v0 }
  0x7d   :  { %v157_v17 = vmul.f32 %v296_v16, %v147_v14  ;;  %162 = vst [vmem:[#allocation5 + $0x9] sm:$0x1] %v296_v16  ;;  %v160_v22 = vadd.f32 %v296_v16, %v159_v20 }
  0x7f   :  { %v158_v18 = vsub.f32 %v153_v15, %v157_v17  ;;  %v172_v28 = vmul.f32 0.98347145, %v160_v22 }
  0x81   :  { %v165_v21 = vmul.f32 0.95122945, %v158_v18 }
  0x83   :  { %v166_v23 = vadd.f32 %v165_v21, %v164_v19 }
  0x85   :  { %vm167_vm10 = vcmp.gt.f32.partialorder %v166_v23, %v160_v22 }
  0x86   :  { %v297_v24 = vsel %vm167_vm10, 1.0, %v408_v0 }
  0x87   :  { %v170_v25 = vmul.f32 %v297_v24, %v160_v22  ;;  %175 = vst [vmem:[#allocation5 + $0xa] sm:$0x1] %v297_v24  ;;  %v173_v30 = vadd.f32 %v297_v24, %v172_v28 }
  0x89   :  { %v171_v26 = vsub.f32 %v166_v23, %v170_v25  ;;  %v185_v36 = vmul.f32 0.98347145, %v173_v30 }
  0x8b   :  { %v178_v29 = vmul.f32 0.95122945, %v171_v26 }
  0x8d   :  { %v179_v31 = vadd.f32 %v178_v29, %v177_v27 }
  0x8f   :  { %vm180_vm11 = vcmp.gt.f32.partialorder %v179_v31, %v173_v30 }
  0x90   :  { %v298_v32 = vsel %vm180_vm11, 1.0, %v408_v0 }
  0x91   :  { %v183_v33 = vmul.f32 %v298_v32, %v173_v30  ;;  %188 = vst [vmem:[#allocation5 + $0xb] sm:$0x1] %v298_v32  ;;  %v186_v38 = vadd.f32 %v298_v32, %v185_v36 }
  0x93   :  { %v184_v34 = vsub.f32 %v179_v31, %v183_v33  ;;  %v198_v44 = vmul.f32 0.98347145, %v186_v38 }
  0x95   :  { %v191_v37 = vmul.f32 0.95122945, %v184_v34 }
  0x97   :  { %v192_v39 = vadd.f32 %v191_v37, %v190_v35 }
  0x99   :  { %vm193_vm12 = vcmp.gt.f32.partialorder %v192_v39, %v186_v38 }
  0x9a   :  { %v299_v40 = vsel %vm193_vm12, 1.0, %v408_v0 }
  0x9b   :  { %v196_v41 = vmul.f32 %v299_v40, %v186_v38  ;;  %201 = vst [vmem:[#allocation5 + $0xc] sm:$0x1] %v299_v40  ;;  %v199_v46 = vadd.f32 %v299_v40, %v198_v44 }
  0x9d   :  { %v197_v42 = vsub.f32 %v192_v39, %v196_v41  ;;  %v211_v52 = vmul.f32 0.98347145, %v199_v46 }
  0x9f   :  { %v204_v45 = vmul.f32 0.95122945, %v197_v42 }
  0xa1   :  { %v205_v47 = vadd.f32 %v204_v45, %v203_v43 }
  0xa3   :  { %vm206_vm13 = vcmp.gt.f32.partialorder %v205_v47, %v199_v46 }
  0xa4   :  { %v300_v48 = vsel %vm206_vm13, 1.0, %v408_v0 }
  0xa5   :  { %v209_v49 = vmul.f32 %v300_v48, %v199_v46  ;;  %214 = vst [vmem:[#allocation5 + $0xd] sm:$0x1] %v300_v48  ;;  %v212_v54 = vadd.f32 %v300_v48, %v211_v52 }
  0xa7   :  { %v210_v50 = vsub.f32 %v205_v47, %v209_v49  ;;  %v224_v59 = vmul.f32 0.98347145, %v212_v54 }
  0xa9   :  { %v217_v53 = vmul.f32 0.95122945, %v210_v50 }
  0xab   :  { %v218_v55 = vadd.f32 %v217_v53, %v216_v51 }
  0xad   :  { %vm219_vm14 = vcmp.gt.f32.partialorder %v218_v55, %v212_v54 }
  0xae   :  { %v301_v56 = vsel %vm219_vm14, 1.0, %v408_v0 }
  0xaf   :  { %v222_v57 = vmul.f32 %v301_v56, %v212_v54  ;;  %227 = vst [vmem:[#allocation5 + $0xe] sm:$0x1] %v301_v56  ;;  %v225_v61 = vadd.f32 %v301_v56, %v224_v59 }
  0xb1   :  { %v223_v58 = vsub.f32 %v218_v55, %v222_v57  ;;  %v237_v1 = vmul.f32 0.98347145, %v225_v61 }
  0xb3   :  { %v230_v62 = vmul.f32 0.95122945, %v223_v58 }
  0xb5   :  { %v231_v63 = vadd.f32 %v230_v62, %v229_v60 }
  0xb7   :  { %vm232_vm15 = vcmp.gt.f32.partialorder %v231_v63, %v225_v61 }
  0xb8   :  { %v302_v2 = vsel %vm232_vm15, 1.0, %v408_v0 }
  0xb9   :  { %v235_v3 = vmul.f32 %v302_v2, %v225_v61  ;;  %v238_v4 = vadd.f32 %v302_v2, %v237_v1  ;;  %240 = vst [vmem:[#allocation5 + $0xf] sm:$0x1] %v302_v2 }
  0xba   :  { %344 = shalt.err (!%p341_p12)
}
  0xbb   :  { %s345_s7 = scalar_lea.hbm %s513_s1, 256 }
  0xbc   :  { %p346_p13 = scmp.ne.s32.totalorder %s513_s1, %s345_s7  ;;  %p349_p0 = scmp.lt.u32.totalorder %s345_s7, %s513_s1 }
  0xbe   :  { %p351_p1 = pnand %p349_p0, %p346_p13 }
  0xc0   :  { %354 = shalt.err (!%p351_p1)
}
  0xc1   :  { %254 = dma.vmem_to_hbm [thread:$0]  %s249_s26, 256, %s513_s1, [#allocation4], %s406_s22, %s406_s22, %s407_s23   ;;  %v236_v0 = vsub.f32 %v231_v63, %v235_v3  ;;  %242 = vst [vmem:[#allocation8] sm:$0x1] %v238_v4 }
  0xc2   :  { %s355_s14 = scalar_lea.vmem %s262_s28, 16  ;;  %s359_s15 = scalar_lea.vmem %s262_s28, 32 }
  0xc3   :  { %241 = vst [vmem:[#allocation6] sm:$0x1] %v236_v0  ;;  %p356_p2 = scmp.ne.s32.totalorder %s262_s28, %s355_s14  ;;  %p360_p3 = scmp.lt.s32.totalorder %s262_s28, %s262_s28 }
  0xc4   :  { %p361_p4 = scmp.lt.s32.totalorder %s359_s15, %s355_s14 }
  0xc6   :  { %p362_p5 = por %p361_p4, %p360_p3 }
  0xc8   :  { %p363_p6 = pnand %p362_p5, %p356_p2 }
  0xca   :  { %366 = shalt.err (!%p363_p6)
}
  0xcb   :  { %s367_s18 = scalar_lea.hbm %s514_s2, 16 }
  0xcc   :  { %p368_p7 = scmp.ne.s32.totalorder %s514_s2, %s367_s18  ;;  %p371_p8 = scmp.lt.u32.totalorder %s367_s18, %s514_s2 }
  0xce   :  { %p373_p9 = pnand %p371_p8, %p368_p7 }
  0xd0   :  { %376 = shalt.err (!%p373_p9)
}
  0xd1   :  { %264 = dma.vmem_to_hbm [thread:$0]  %s262_s28, 16, %s514_s2, [#allocation7]  }
  0xd2   :  { %s377_s24 = scalar_lea.vmem %s480_s30, 16  ;;  %s381_s25 = scalar_lea.vmem %s480_s30, 32 }
  0xd3   :  { %p378_p10 = scmp.ne.s32.totalorder %s480_s30, %s377_s24  ;;  %p382_p11 = scmp.lt.s32.totalorder %s480_s30, %s480_s30 }
  0xd4   :  { %p383_p12 = scmp.lt.s32.totalorder %s381_s25, %s377_s24 }
  0xd6   :  { %p384_p13 = por %p383_p12, %p382_p11 }
  0xd8   :  { %p385_p0 = pnand %p384_p13, %p378_p10 }
  0xda   :  { %388 = shalt.err (!%p385_p0)
}
  0xdb   :  { %s389_s27 = scalar_lea.hbm %s515_s3, 16 }
  0xdc   :  { %p390_p1 = scmp.ne.s32.totalorder %s515_s3, %s389_s27  ;;  %p393_p2 = scmp.lt.u32.totalorder %s389_s27, %s515_s3 }
  0xde   :  { %p395_p3 = pnand %p393_p2, %p390_p1 }
  0xe0   :  { %398 = shalt.err (!%p395_p3)
}
  0xe1   :  { %274 = dma.vmem_to_hbm [thread:$0]  %s480_s30, 16, %s515_s3, [#allocation7]  }
  0xe2   :  { %401 = dma.done.wait [#allocation4], 256  }
  0xe3   :  { %402 = vsyncadd [#allocation4], 4294967040 }
  0xe4   :  { %403 = dma.done.wait [#allocation7], 32  }
  0xe5   :  { %404 = vsyncadd [#allocation7], 4294967264 }
  0xe6   :  { %284 = vsyncpa [#allocation3], 1 }
  0xe7   :  { %285 = vsyncpa [#allocation4], 1 }
  0xe8   :  { %286 = vsyncpa [#allocation7], 1 }

</bundles_post_ra>
